<compile_context>
chip_gen: v5e
topology: v5e:2x2
jax: 0.10.0
libtpu: 0.0.40
codegen_flags: <defaults>
</compile_context>

<pallas_src>
import jax
import jax.numpy as jnp
from jax.experimental import pallas as pl
from jax.experimental.pallas import tpu as pltpu


LANE_W = 512                 # lane-dense slab width (multiple of 128)
TILE_R = 2048                # rows per grid step: 2048 x 512 f32 = 4 MiB per block
VMEM_LIMIT_BYTES = 48 << 20  # fits in+out double buffers (16 MiB) with headroom on all gens


def _pow_static(dist, b_static):
    """dist ** b_static for b_static > 0 with 2*b_static a small integer.

    Square-and-multiply (plus at most one sqrt) — no exp/log pair.
    dist >= 0 by construction.
    """
    two_b = int(round(2.0 * b_static))
    k, half = divmod(two_b, 2)
    p = None
    base = dist
    e = k
    while e > 0:                      # binary exponentiation for dist**k
        if e & 1:
            p = base if p is None else p * base
        e >>= 1
        if e:
            base = base * base
    if half:
        s = jnp.sqrt(dist)
        p = s if p is None else p * s
    if p is None:
        p = jnp.ones_like(dist)
    return p


def _bell_math(x_f32, c_f, inv_a2_f, b_f, b_static):
    d = x_f32 - c_f
    dist = d * d * inv_a2_f                     # ((x - c) / a)^2 without a divide
    if b_static is not None:
        p = _pow_static(dist, b_static)         # multiplies (+ sqrt) only
    else:
        p = jnp.power(dist, jnp.float32(b_f))   # generic float exponent
    return 1.0 / (1.0 + p)                      # exact divide (keeps 1e-6 accuracy)


def _make_bell_kernel(c_f, inv_a2_f, b_f, b_static):
    """Elementwise kernel with the scalar parameters baked in as constants."""

    def kernel(x_ref, o_ref):
        x = x_ref[...].astype(jnp.float32)
        o_ref[...] = _bell_math(x, c_f, inv_a2_f, b_f, b_static).astype(o_ref.dtype)

    return kernel


# Cache for the dimension-semantics choice (CORE_PARALLEL where supported).
_SEMANTICS_CACHE = {"value": None}


def _run_pallas(x2d, kernel, tile_r, out_dtype, cost):
    rows = x2d.shape[0]
    grid = (pl.cdiv(rows, tile_r),)

    def call(sem):
        return pl.pallas_call(
            kernel,
            out_shape=jax.ShapeDtypeStruct((rows, LANE_W), out_dtype),
            grid=grid,
            in_specs=[pl.BlockSpec((tile_r, LANE_W), lambda i: (i, 0))],
            out_specs=pl.BlockSpec((tile_r, LANE_W), lambda i: (i, 0)),
            compiler_params=pltpu.CompilerParams(
                dimension_semantics=(sem,),
                vmem_limit_bytes=VMEM_LIMIT_BYTES,
            ),
            cost_estimate=cost,
        )(x2d)

    cached = _SEMANTICS_CACHE["value"]
    if cached is not None:
        return call(cached)

    core_parallel = getattr(pltpu, "CORE_PARALLEL", None)
    if core_parallel is not None:
        try:
            out = call(core_parallel)            # split grid across TensorCores (v7x)
            jax.block_until_ready(out)
            _SEMANTICS_CACHE["value"] = core_parallel
            return out
        except Exception:
            pass                                 # single-TC chip or unsupported: fall back

    _SEMANTICS_CACHE["value"] = "parallel"
    return call("parallel")


def bell_memb_func(x, a, b, c):
    """Apply the generalised Bell membership function elementwise to x.

    x: any-shape float array (e.g. NCHW activations).
    a, b, c: Python float scalar parameters of the module.
    """
    orig_shape = x.shape
    orig_dtype = x.dtype

    a_f, b_f, c_f = float(a), float(b), float(c)
    inv_a2 = 1.0 / (a_f * a_f)

    # Host-side exponent specialisation: b > 0 with 2*b a small integer.
    b_static = None
    if b_f > 0.0 and abs(2.0 * b_f - round(2.0 * b_f)) < 1e-12 and round(2.0 * b_f) <= 16:
        b_static = b_f

    flat = x.reshape(-1)
    n = flat.shape[0]
    aligned_n = (n // LANE_W) * LANE_W

    def tail_compute(t):
        return _bell_math(t.astype(jnp.float32), c_f, inv_a2, b_f, b_static).astype(orig_dtype)

    if aligned_n == 0:
        # Whole input smaller than one lane-dense row: plain jnp is cheaper.
        return tail_compute(flat).reshape(orig_shape)

    kernel = _make_bell_kernel(c_f, inv_a2, b_f, b_static)

    rows = aligned_n // LANE_W
    head = flat if aligned_n == n else flat[:aligned_n]
    x2d = head.reshape(rows, LANE_W)

    # Row tile: full slab when small (block == array dim is always legal),
    # else a fixed 2048-row tile (multiple of 8) -> 4 MiB f32 blocks.
    tile_r = rows if rows <= TILE_R else TILE_R

    itemsize = jnp.dtype(orig_dtype).itemsize
    n_elems = rows * LANE_W
    cost = pl.CostEstimate(
        flops=6 * n_elems,
        # static path: sqrt + divide; generic path: exp + log + divide
        transcendentals=(2 if b_static is not None else 3) * n_elems,
        bytes_accessed=2 * n_elems * itemsize,
    )

    out = _run_pallas(x2d, kernel, tile_r, orig_dtype, cost).reshape(-1)

    if aligned_n != n:
        out = jnp.concatenate([out, tail_compute(flat[aligned_n:])])

    return out.reshape(orig_shape)


if __name__ == "__main__":
    # Scalar parameters of the module (half-width a, slope b, center c).
    a, b, c = 2.0, 1.5, 0.5

    key = jax.random.PRNGKey(0)
    x = jax.random.normal(key, (2, 4, 16, 16), dtype=jnp.float32)  # NCHW-style input

    y = bell_memb_func(x, a, b, c)
    y = jax.block_until_ready(y)

    # Reference check in plain JAX, same math as the torch forward.
    dist_ref = ((x - c) / a) ** 2
    y_ref = 1.0 / (1.0 + jnp.power(dist_ref, b))

    assert y.shape == x.shape
    assert y.dtype == x.dtype
    assert jnp.allclose(y, y_ref, atol=1e-6, rtol=1e-5)

    print("KERNEL_OK")
</pallas_src>

<mosaic_0001>
module attributes {stable_mosaic.version = 11 : i64} {
  func.func @kernel(%arg0: i32, %arg1: memref<4x512xf32, #tpu.memory_space<vmem>>, %arg2: memref<4x512xf32, #tpu.memory_space<vmem>>) attributes {dimension_semantics = [#tpu.dimension_semantics<core_parallel>], iteration_bounds = array<i64: 1>, scalar_prefetch = 0 : i64, scratch_operands = 0 : i64, tpu.core_type = #tpu.core_type<tc>, window_params = [{transform_indices = @transform_0, window_bounds = array<i64: 4, 512>}, {transform_indices = @transform_1, window_bounds = array<i64: 4, 512>}]} {
    %c0 = arith.constant 0 : index
    %c0_0 = arith.constant 0 : index
    %0 = vector.load %arg1[%c0, %c0_0] : memref<4x512xf32, #tpu.memory_space<vmem>>, vector<4x512xf32>
    %cst = arith.constant 5.000000e-01 : f32
    %1 = vector.broadcast %cst : f32 to vector<4x512xf32>
    %2 = arith.subf %0, %1 : vector<4x512xf32>
    %3 = arith.mulf %2, %2 : vector<4x512xf32>
    %cst_1 = arith.constant 2.500000e-01 : f32
    %4 = vector.broadcast %cst_1 : f32 to vector<4x512xf32>
    %5 = arith.mulf %3, %4 : vector<4x512xf32>
    %6 = math.sqrt %5 : vector<4x512xf32>
    %7 = arith.mulf %5, %6 : vector<4x512xf32>
    %cst_2 = arith.constant 1.000000e+00 : f32
    %8 = vector.broadcast %cst_2 : f32 to vector<4x512xf32>
    %9 = arith.addf %8, %7 : vector<4x512xf32>
    %cst_3 = arith.constant 1.000000e+00 : f32
    %10 = vector.broadcast %cst_3 : f32 to vector<4x512xf32>
    %11 = arith.divf %10, %9 : vector<4x512xf32>
    %c0_4 = arith.constant 0 : index
    %c0_5 = arith.constant 0 : index
    %12 = vector.load %arg2[%c0_4, %c0_5] : memref<4x512xf32, #tpu.memory_space<vmem>>, vector<4x512xf32>
    tpu.vector_store %arg2[%c0_4, %c0_5], %11 {strides = array<i32>} : memref<4x512xf32, #tpu.memory_space<vmem>>, vector<4x512xf32>,
    return
  }
  func.func @transform_0(%arg0: i32) -> (i32, i32) {
    %c0_i32 = arith.constant 0 : i32
    %c0_i32_0 = arith.constant 0 : i32
    return %arg0, %c0_i32 : i32, i32
  }
  func.func @transform_1(%arg0: i32) -> (i32, i32) {
    %c0_i32 = arith.constant 0 : i32
    %c0_i32_0 = arith.constant 0 : i32
    return %arg0, %c0_i32 : i32, i32
  }
}

module attributes {stable_mosaic.version = 11 : i64} {
  func.func @kernel(%arg0: i32, %arg1: memref<4x512xf32, #tpu.memory_space<vmem>>, %arg2: memref<4x512xf32, #tpu.memory_space<vmem>>) attributes {dimension_semantics = [#tpu.dimension_semantics<parallel>], iteration_bounds = array<i64: 1>, scalar_prefetch = 0 : i64, scratch_operands = 0 : i64, tpu.core_type = #tpu.core_type<tc>, window_params = [{transform_indices = @transform_0, window_bounds = array<i64: 4, 512>}, {transform_indices = @transform_1, window_bounds = array<i64: 4, 512>}]} {
    %c0 = arith.constant 0 : index
    %c0_0 = arith.constant 0 : index
    %0 = vector.load %arg1[%c0, %c0_0] : memref<4x512xf32, #tpu.memory_space<vmem>>, vector<4x512xf32>
    %cst = arith.constant 5.000000e-01 : f32
    %1 = vector.broadcast %cst : f32 to vector<4x512xf32>
    %2 = arith.subf %0, %1 : vector<4x512xf32>
    %3 = arith.mulf %2, %2 : vector<4x512xf32>
    %cst_1 = arith.constant 2.500000e-01 : f32
    %4 = vector.broadcast %cst_1 : f32 to vector<4x512xf32>
    %5 = arith.mulf %3, %4 : vector<4x512xf32>
    %6 = math.sqrt %5 : vector<4x512xf32>
    %7 = arith.mulf %5, %6 : vector<4x512xf32>
    %cst_2 = arith.constant 1.000000e+00 : f32
    %8 = vector.broadcast %cst_2 : f32 to vector<4x512xf32>
    %9 = arith.addf %8, %7 : vector<4x512xf32>
    %cst_3 = arith.constant 1.000000e+00 : f32
    %10 = vector.broadcast %cst_3 : f32 to vector<4x512xf32>
    %11 = arith.divf %10, %9 : vector<4x512xf32>
    %c0_4 = arith.constant 0 : index
    %c0_5 = arith.constant 0 : index
    %12 = vector.load %arg2[%c0_4, %c0_5] : memref<4x512xf32, #tpu.memory_space<vmem>>, vector<4x512xf32>
    tpu.vector_store %arg2[%c0_4, %c0_5], %11 {strides = array<i32>} : memref<4x512xf32, #tpu.memory_space<vmem>>, vector<4x512xf32>,
    return
  }
  func.func @transform_0(%arg0: i32) -> (i32, i32) {
    %c0_i32 = arith.constant 0 : i32
    %c0_i32_0 = arith.constant 0 : i32
    return %arg0, %c0_i32 : i32, i32
  }
  func.func @transform_1(%arg0: i32) -> (i32, i32) {
    %c0_i32 = arith.constant 0 : i32
    %c0_i32_0 = arith.constant 0 : i32
    return %arg0, %c0_i32 : i32, i32
  }
}

</mosaic_0001>

<bundles_post_ra>
// kernel: tpu_custom_call.1
= control target key start
LH: loop header
LB: loop body
LE: loop exit
PB: predicated region body
PF: predicated region fallthrough
CT: control target
= control target key end

     0   :  { %s200_s6 = sld [smem:[#allocation0]]   ;;  %s219_s0 = inlined_call_operand.hbm [shape: f32[4,512], index: 0, kind: input, shape index: {}]   ;;  %s220_s1 = inlined_call_operand.hbm [shape: f32[4,512], index: 1, kind: output, shape index: {}]  }
   0x1   :  { %6 = vsyncpa [#allocation3], 0 }
   0x2   :  { %7 = vsyncpa [#allocation4], 0  ;;  %s188_s11 = smov [#allocation2]   ;;  %s140_s18 = scalar_lea.hbm %s219_s0, 16 }
   0x3   :  { %s18_s12 = sshll.u32 %s188_s11, 4  ;;  %s19_s12 = int_to_ptr.vmem [resolvable:$true] %s18_s12 }
   0x6   :  { %s124_s7 = sshll.u32 %s200_s6, 4 }
   0x7   :  { %s14_s10 = scalar_lea.hbm %s219_s0, %s124_s7 }
   0x8   :  { %s16_s13 = sshll.u32 %s14_s10, 4  ;;  %s17_s13 = int_to_ptr.hbm [resolvable:$true] %s16_s13 }
   0x9   :  { %s136_s14 = sshra.s32 %s17_s13, 4  ;;  %s137_s14 = int_to_ptr.hbm [resolvable:$true] %s136_s14 }
   0xa   :  { %s138_s15 = scalar_lea.hbm %s137_s14, 16 }
   0xb   :  { %p139_p0 = scmp.ne.s32.totalorder %s137_s14, %s138_s15  ;;  %p142_p1 = scmp.lt.s32.totalorder %s140_s18, %s138_s15 }
   0xd   :  { %p144_p2 = pnand %p142_p1, %p139_p0 }
   0xf   :  { %147 = shalt.err (!%p144_p2)
}
  0x10   :  { %21 = dma.hbm_to_vmem [thread:$0]  %s17_s13, 256, %s19_s12, [#allocation3]  }
  0x11   :  { %184 = dma.done.wait [#allocation3], 256  }
  0x12   :  { %185 = vsyncadd [#allocation3], 4294967040  ;;  %v26_v0 = vld [vmem:[#allocation2] sm:$0xff]  ;;  %v27_v1 = vld [vmem:[#allocation2 + $0x8] sm:$0xff]  ;;  %s100_s20 = scalar_lea.hbm %s220_s1, %s124_s7  ;;  %s189_s21 = smov [#allocation5]  }
  0x13   :  { %v120_v2 = vadd.f32 -0.5, %v26_v0  ;;  %v121_v3 = vadd.f32 -0.5, %v27_v1  ;;  %s102_s22 = sshll.u32 %s189_s21, 4  ;;  %s104_s23 = sshll.u32 %s100_s20, 4  ;;  %s103_s22 = int_to_ptr.vmem [resolvable:$true] %s102_s22  ;;  %s105_s23 = int_to_ptr.hbm [resolvable:$true] %s104_s23 }
  0x14   :  { %s172_s24 = sshra.s32 %s105_s23, 4  ;;  %s176_s28 = scalar_lea.hbm %s220_s1, 16  ;;  %s173_s24 = int_to_ptr.hbm [resolvable:$true] %s172_s24 }
  0x15   :  { %v30_v4 = vmul.f32 %v120_v2, %v120_v2  ;;  %v31_v5 = vmul.f32 %v121_v3, %v121_v3  ;;  %s174_s25 = scalar_lea.hbm %s173_s24, 16 }
  0x16   :  { %p175_p3 = scmp.ne.s32.totalorder %s173_s24, %s174_s25  ;;  %p178_p4 = scmp.lt.s32.totalorder %s176_s28, %s174_s25 }
  0x17   :  { %v32_v6 = vmul.f32 0.25, %v30_v4  ;;  %v33_v7 = vmul.f32 0.25, %v31_v5 }
  0x18   :  { %p180_p5 = pnand %p178_p4, %p175_p3 }
  0x19   :  { %128 = vrsqrt.f32 %v32_v6  ;;  %vm41_vm0 = vcmp.eq.f32.partialorder %v32_v6, inf  ;;  %v44_v19 = vand.u32 2147483648, %v32_v6  ;;  %vm43_vm1 = vcmp.eq.f32.partialorder %v32_v6, 0.0 }
  0x1a   :  { %130 = vrsqrt.f32 %v33_v7  ;;  %vm53_vm2 = vcmp.eq.f32.partialorder %v33_v7, inf  ;;  %v56_v22 = vand.u32 2147483648, %v33_v7  ;;  %vm55_vm3 = vcmp.eq.f32.partialorder %v33_v7, 0.0 }
  0x1f   :  { %v129_v8 = vpop.eup %128 }
  0x20   :  { %v131_v9 = vpop.eup %130  ;;  %v35_v10 = vmul.f32 %v129_v8, %v32_v6 }
  0x21   :  { %v47_v11 = vmul.f32 %v131_v9, %v33_v7 }
  0x22   :  { %v36_v12 = vmul.f32 %v129_v8, %v35_v10 }
  0x23   :  { %v48_v13 = vmul.f32 %v131_v9, %v47_v11 }
  0x24   :  { %v37_v14 = vmul.f32 0.5, %v36_v12 }
  0x25   :  { %v49_v15 = vmul.f32 0.5, %v48_v13 }
  0x26   :  { %v38_v16 = vsub.f32 1.5, %v37_v14 }
  0x27   :  { %v50_v17 = vsub.f32 1.5, %v49_v15 }
  0x28   :  { %v39_v18 = vmul.f32 %v129_v8, %v38_v16 }
  0x29   :  { %v51_v20 = vmul.f32 %v131_v9, %v50_v17 }
  0x2a   :  { %v40_v21 = vmul.f32 %v39_v18, %v32_v6 }
  0x2b   :  { %v52_v23 = vmul.f32 %v51_v20, %v33_v7 }
  0x2c   :  { %v42_v24 = vsel %vm41_vm0, %v32_v6, %v40_v21 }
  0x2d   :  { %v45_v25 = vsel %vm43_vm1, %v44_v19, %v42_v24  ;;  %v54_v26 = vsel %vm53_vm2, %v33_v7, %v52_v23 }
  0x2e   :  { %v58_v27 = vmul.f32 %v45_v25, %v32_v6  ;;  %v57_v28 = vsel %vm55_vm3, %v56_v22, %v54_v26 }
  0x2f   :  { %v59_v29 = vmul.f32 %v57_v28, %v33_v7 }
  0x30   :  { %v60_v30 = vadd.f32 1.0, %v58_v27 }
  0x31   :  { %v61_v31 = vadd.f32 1.0, %v59_v29 }
  0x32   :  { %132 = vrcp.f32 %v60_v30  ;;  %vm67_vm4 = vweird.f32 %v60_v30  ;;  %v73_v35 = vand.u32 2147483648, %v60_v30  ;;  %v71_v38 = vand.u32 2147483647, %v60_v30 }
  0x33   :  { %134 = vrcp.f32 %v61_v31  ;;  %v88_v39 = vand.u32 2147483648, %v61_v31  ;;  %vm82_vm6 = vweird.f32 %v61_v31  ;;  %v86_v41 = vand.u32 2147483647, %v61_v31 }
  0x34   :  { %v74_v43 = vor.u32 1.1754944e-38, %v73_v35  ;;  %vm72_vm9 = vcmp.eq.f32.partialorder %v71_v38, 8.507059e+37 }
  0x35   :  { %v89_v46 = vor.u32 1.1754944e-38, %v88_v39  ;;  %vm87_vm11 = vcmp.eq.f32.partialorder %v86_v41, 8.507059e+37 }
  0x38   :  { %v133_v32 = vpop.eup %132 }
  0x39   :  { %v135_v33 = vpop.eup %134  ;;  %v63_v34 = vmul.f32 %v133_v32, %v60_v30  ;;  %vm68_vm5 = vweird.f32 %v133_v32 }
  0x3a   :  { %v78_v36 = vmul.f32 %v135_v33, %v61_v31  ;;  %vm83_vm7 = vweird.f32 %v135_v33  ;;  %vm69_vm8 = vmor %vm67_vm4, %vm68_vm5 }
  0x3b   :  { %v64_v37 = vsub.f32 1.0, %v63_v34  ;;  %vm84_vm10 = vmor %vm82_vm6, %vm83_vm7 }
  0x3c   :  { %v79_v40 = vsub.f32 1.0, %v78_v36 }
  0x3d   :  { %v65_v42 = vmul.f32 %v133_v32, %v64_v37 }
  0x3e   :  { %v80_v44 = vmul.f32 %v135_v33, %v79_v40 }
  0x3f   :  { %v66_v45 = vadd.f32 %v133_v32, %v65_v42 }
  0x40   :  { %v81_v47 = vadd.f32 %v135_v33, %v80_v44 }
  0x41   :  { %v70_v48 = vsel %vm69_vm8, %v133_v32, %v66_v45 }
  0x42   :  { %v75_v49 = vsel %vm72_vm9, %v74_v43, %v70_v48  ;;  %v85_v50 = vsel %vm84_vm10, %v135_v33, %v81_v47 }
  0x43   :  { %92 = vst [vmem:[#allocation5] sm:$0xff] %v75_v49  ;;  %v90_v51 = vsel %vm87_vm11, %v89_v46, %v85_v50 }
  0x44   :  { %93 = vst [vmem:[#allocation5 + $0x8] sm:$0xff] %v90_v51 }
  0x45   :  { %183 = shalt.err (!%p180_p5)
}
  0x46   :  { %107 = dma.vmem_to_hbm [thread:$0]  %s103_s22, 256, %s105_s23, [#allocation4]  }
  0x47   :  { %186 = dma.done.wait [#allocation4], 256  }
  0x48   :  { %187 = vsyncadd [#allocation4], 4294967040 }
  0x49   :  { %112 = vsyncpa [#allocation3], 1 }
  0x4a   :  { %113 = vsyncpa [#allocation4], 1 }

// kernel: tpu_custom_call.1
= control target key start
LH: loop header
LB: loop body
LE: loop exit
PB: predicated region body
PF: predicated region fallthrough
CT: control target
= control target key end

     0   :  { %6 = vsyncpa [#allocation3], 0  ;;  %s190_s0 = inlined_call_operand.hbm [shape: f32[4,512], index: 0, kind: input, shape index: {}]   ;;  %s191_s1 = inlined_call_operand.hbm [shape: f32[4,512], index: 1, kind: output, shape index: {}]  }
   0x1   :  { %7 = vsyncpa [#allocation4], 0  ;;  %s13_s8 = sshll.u32 %s190_s0, 4  ;;  %s172_s9 = smov [#allocation2]   ;;  %s14_s8 = int_to_ptr.hbm [resolvable:$true] %s13_s8 }
   0x2   :  { %s15_s10 = sshll.u32 %s172_s9, 4  ;;  %s16_s10 = int_to_ptr.vmem [resolvable:$true] %s15_s10 }
   0x3   :  { %18 = dma.hbm_to_vmem [thread:$0]  %s14_s8, 256, %s16_s10, [#allocation3]  }
   0x4   :  { %168 = dma.done.wait [#allocation3], 256  }
   0x5   :  { %169 = vsyncadd [#allocation3], 4294967040  ;;  %v23_v0 = vld [vmem:[#allocation2] sm:$0xff]  ;;  %v24_v1 = vld [vmem:[#allocation2 + $0x8] sm:$0xff]  ;;  %s173_s0 = smov [#allocation5]   ;;  %s98_s14 = sshll.u32 %s191_s1, 4  ;;  %s99_s14 = int_to_ptr.hbm [resolvable:$true] %s98_s14 }
   0x6   :  { %v108_v2 = vadd.f32 -0.5, %v23_v0  ;;  %v109_v3 = vadd.f32 -0.5, %v24_v1  ;;  %s96_s11 = sshll.u32 %s173_s0, 4  ;;  %s97_s11 = int_to_ptr.vmem [resolvable:$true] %s96_s11 }
   0x8   :  { %v27_v4 = vmul.f32 %v108_v2, %v108_v2  ;;  %v28_v5 = vmul.f32 %v109_v3, %v109_v3 }
   0xa   :  { %v29_v6 = vmul.f32 0.25, %v27_v4  ;;  %v30_v7 = vmul.f32 0.25, %v28_v5 }
   0xc   :  { %112 = vrsqrt.f32 %v29_v6  ;;  %vm38_vm0 = vcmp.eq.f32.partialorder %v29_v6, inf  ;;  %v41_v19 = vand.u32 2147483648, %v29_v6  ;;  %vm40_vm1 = vcmp.eq.f32.partialorder %v29_v6, 0.0 }
   0xd   :  { %114 = vrsqrt.f32 %v30_v7  ;;  %vm50_vm2 = vcmp.eq.f32.partialorder %v30_v7, inf  ;;  %v53_v22 = vand.u32 2147483648, %v30_v7  ;;  %vm52_vm3 = vcmp.eq.f32.partialorder %v30_v7, 0.0 }
  0x12   :  { %v113_v8 = vpop.eup %112 }
  0x13   :  { %v115_v9 = vpop.eup %114  ;;  %v32_v10 = vmul.f32 %v113_v8, %v29_v6 }
  0x14   :  { %v44_v11 = vmul.f32 %v115_v9, %v30_v7 }
  0x15   :  { %v33_v12 = vmul.f32 %v113_v8, %v32_v10 }
  0x16   :  { %v45_v13 = vmul.f32 %v115_v9, %v44_v11 }
  0x17   :  { %v34_v14 = vmul.f32 0.5, %v33_v12 }
  0x18   :  { %v46_v15 = vmul.f32 0.5, %v45_v13 }
  0x19   :  { %v35_v16 = vsub.f32 1.5, %v34_v14 }
  0x1a   :  { %v47_v17 = vsub.f32 1.5, %v46_v15 }
  0x1b   :  { %v36_v18 = vmul.f32 %v113_v8, %v35_v16 }
  0x1c   :  { %v48_v20 = vmul.f32 %v115_v9, %v47_v17 }
  0x1d   :  { %v37_v21 = vmul.f32 %v36_v18, %v29_v6 }
  0x1e   :  { %v49_v23 = vmul.f32 %v48_v20, %v30_v7 }
  0x1f   :  { %v39_v24 = vsel %vm38_vm0, %v29_v6, %v37_v21 }
  0x20   :  { %v42_v25 = vsel %vm40_vm1, %v41_v19, %v39_v24  ;;  %v51_v26 = vsel %vm50_vm2, %v30_v7, %v49_v23 }
  0x21   :  { %v55_v27 = vmul.f32 %v42_v25, %v29_v6  ;;  %v54_v28 = vsel %vm52_vm3, %v53_v22, %v51_v26 }
  0x22   :  { %v56_v29 = vmul.f32 %v54_v28, %v30_v7 }
  0x23   :  { %v57_v30 = vadd.f32 1.0, %v55_v27 }
  0x24   :  { %v58_v31 = vadd.f32 1.0, %v56_v29 }
  0x25   :  { %116 = vrcp.f32 %v57_v30  ;;  %vm64_vm4 = vweird.f32 %v57_v30  ;;  %v70_v35 = vand.u32 2147483648, %v57_v30  ;;  %v68_v38 = vand.u32 2147483647, %v57_v30 }
  0x26   :  { %118 = vrcp.f32 %v58_v31  ;;  %v85_v39 = vand.u32 2147483648, %v58_v31  ;;  %vm79_vm6 = vweird.f32 %v58_v31  ;;  %v83_v41 = vand.u32 2147483647, %v58_v31 }
  0x27   :  { %v71_v43 = vor.u32 1.1754944e-38, %v70_v35  ;;  %vm69_vm9 = vcmp.eq.f32.partialorder %v68_v38, 8.507059e+37 }
  0x28   :  { %v86_v46 = vor.u32 1.1754944e-38, %v85_v39  ;;  %vm84_vm11 = vcmp.eq.f32.partialorder %v83_v41, 8.507059e+37 }
  0x2b   :  { %v117_v32 = vpop.eup %116 }
  0x2c   :  { %v119_v33 = vpop.eup %118  ;;  %v60_v34 = vmul.f32 %v117_v32, %v57_v30  ;;  %vm65_vm5 = vweird.f32 %v117_v32 }
  0x2d   :  { %v75_v36 = vmul.f32 %v119_v33, %v58_v31  ;;  %vm80_vm7 = vweird.f32 %v119_v33  ;;  %vm66_vm8 = vmor %vm64_vm4, %vm65_vm5 }
  0x2e   :  { %v61_v37 = vsub.f32 1.0, %v60_v34  ;;  %vm81_vm10 = vmor %vm79_vm6, %vm80_vm7 }
  0x2f   :  { %v76_v40 = vsub.f32 1.0, %v75_v36 }
  0x30   :  { %v62_v42 = vmul.f32 %v117_v32, %v61_v37 }
  0x31   :  { %v77_v44 = vmul.f32 %v119_v33, %v76_v40 }
  0x32   :  { %v63_v45 = vadd.f32 %v117_v32, %v62_v42 }
  0x33   :  { %v78_v47 = vadd.f32 %v119_v33, %v77_v44 }
  0x34   :  { %v67_v48 = vsel %vm66_vm8, %v117_v32, %v63_v45 }
  0x35   :  { %v72_v49 = vsel %vm69_vm9, %v71_v43, %v67_v48  ;;  %v82_v50 = vsel %vm81_vm10, %v119_v33, %v78_v47 }
  0x36   :  { %89 = vst [vmem:[#allocation5] sm:$0xff] %v72_v49  ;;  %v87_v51 = vsel %vm84_vm11, %v86_v46, %v82_v50 }
  0x37   :  { %90 = vst [vmem:[#allocation5 + $0x8] sm:$0xff] %v87_v51 }
  0x38   :  { %101 = dma.vmem_to_hbm [thread:$0]  %s97_s11, 256, %s99_s14, [#allocation4]  }
  0x39   :  { %170 = dma.done.wait [#allocation4], 256  }
  0x3a   :  { %171 = vsyncadd [#allocation4], 4294967040 }
  0x3b   :  { %106 = vsyncpa [#allocation3], 1 }
  0x3c   :  { %107 = vsyncpa [#allocation4], 1 }

</bundles_post_ra>
